<compile_context>
chip_gen: v6e
topology: v6e:2x2x1
jax: 0.10.0
libtpu: 0.0.40
codegen_flags: <defaults>
</compile_context>

<pallas_src>
import functools

import jax
import jax.numpy as jnp
from jax.experimental import pallas as pl
from jax.experimental.pallas import tpu as pltpu


def _round_up(x, m):
    return (x + m - 1) // m * m


def _unigat_attend_kernel(b1_ref, e_tgt_ref, e_src_ref, xmsg_ref, out_ref, acc_ref,
                          *, tile_e, xmsg_resident):
    """One (tile_n, tile_e) tile: attention mask + aggregation, accumulated over E."""

    @pl.when(pl.program_id(1) == 0)
    def _init():
        acc_ref[...] = jnp.zeros_like(acc_ref)

    # Additive attention logits for this tile (f32 broadcast add on the VPU).
    logits = e_tgt_ref[...] + e_src_ref[...]            # (tN,1)+(1,tE) -> (tN,tE)

    # ELU(alpha=1), simplified per perf review:
    #   max(x,0) + exp(min(x,0)) - 1
    # exp lowers to the EUP (separate bundle slot); ~5 VPU ops per element total.
    # f32 exp(x)-1 near 0 is accurate to ~1e-7, far below the bf16-MXU tolerance.
    att = jnp.maximum(logits, 0.0) + jnp.exp(jnp.minimum(logits, 0.0)) - 1.0

    # Attention-weighted incidence, computed directly in the MXU operand dtype.
    # B1 is a 0/1 matrix so bf16 storage is lossless; one bf16 multiply, no widen/repack.
    p = b1_ref[...] * att.astype(xmsg_ref.dtype)        # (tN, tE) bf16

    if xmsg_resident:
        # x_msg is VMEM-resident (fetched once); slice out this E tile.
        k = pl.program_id(1)
        start = pl.multiple_of(k * tile_e, tile_e)
        xm = xmsg_ref[pl.ds(start, tile_e), :]
    else:
        xm = xmsg_ref[...]

    # Aggregate edge messages back to nodes on the MXU: bf16 operands, f32 accumulate.
    acc_ref[...] += jnp.dot(p, xm, preferred_element_type=jnp.float32)

    @pl.when(pl.program_id(1) == pl.num_programs(1) - 1)
    def _finalize():
        out_ref[...] = acc_ref[...]


def unigat_layer(x_0, incidence_1, weight, att_weight, *,
                 tile_n=1024, tile_e=4096, matmul_dtype=jnp.bfloat16,
                 xmsg_resident_bytes=8 * 1024 * 1024,
                 vmem_limit_bytes=48 * 1024 * 1024):
    """UniGAT layer forward pass.

    x_0:         (n_nodes, in_channels)   node features
    incidence_1: (n_nodes, n_edges)       dense B_1 (0/1 incidence)
    weight:      (in_channels, out_channels)
    att_weight:  (2*in_channels,)         concat([a_src, a_tgt])
    """
    x_0 = x_0.astype(jnp.float32)
    weight = weight.astype(jnp.float32)
    att_weight = att_weight.astype(jnp.float32)

    n, cin = x_0.shape
    e = incidence_1.shape[1]
    cout = weight.shape[1]
    a_src = att_weight[:cin].reshape(cin, 1)
    a_tgt = att_weight[cin:].reshape(cin, 1)

    # --- Tile-divisible, lane-dense padded shapes. ---
    tile_n = _round_up(min(tile_n, _round_up(n, 16)), 16)     # bf16 sublane packing
    tile_e = _round_up(min(tile_e, _round_up(e, 128)), 128)   # lane-aligned
    n_pad = _round_up(n, tile_n)
    e_pad = _round_up(e, tile_e)
    cout_pad = _round_up(cout, 128)                           # lane-dense output stores

    # Single pad+convert of the (static) incidence; if the caller already holds B1 in
    # `matmul_dtype` this astype is a no-op, and under jit the pad is folded/hoisted.
    b1_p = jnp.pad(incidence_1.astype(matmul_dtype), ((0, n_pad - n), (0, e_pad - e)))
    x0_p = jnp.pad(x_0, ((0, n_pad - n), (0, 0)))

    # --- Edge-side precompute: small dense matmuls, left to XLA. ---
    # m01 is computed from the narrow-dtype B1 copy (halves this pass's HBM read vs f32);
    # padded rows/cols are zero so they contribute nothing.
    m01 = jnp.einsum("ne,nc->ec", b1_p, x0_p.astype(matmul_dtype),
                     preferred_element_type=jnp.float32)      # (E_pad, Cin) f32
    x_msg = m01 @ weight                                      # (E_pad, Cout) f32
    e_src_p = (m01 @ a_src).reshape(1, e_pad)                 # (1, E_pad)  edge logits
    e_tgt_p = x0_p @ a_tgt                                    # (N_pad, 1)  node logits
    xmsg_p = jnp.pad(x_msg, ((0, 0), (0, cout_pad - cout))).astype(matmul_dtype)

    itemsize = jnp.dtype(matmul_dtype).itemsize
    xmsg_bytes = e_pad * cout_pad * itemsize
    xmsg_resident = xmsg_bytes <= xmsg_resident_bytes

    grid = (n_pad // tile_n, e_pad // tile_e)

    if xmsg_resident:
        # Constant index_map -> fetched from HBM exactly once, VMEM-resident thereafter.
        xmsg_spec = pl.BlockSpec((e_pad, cout_pad), lambda i, k: (0, 0))
        xmsg_read_bytes = xmsg_bytes
    else:
        # Streamed per E tile (refetched for every N tile).
        xmsg_spec = pl.BlockSpec((tile_e, cout_pad), lambda i, k: (k, 0))
        xmsg_read_bytes = xmsg_bytes * grid[0]

    cost = pl.CostEstimate(
        flops=int(2 * n_pad * e_pad * cout_pad + 6 * n_pad * e_pad),
        transcendentals=int(n_pad * e_pad),
        bytes_accessed=int(n_pad * e_pad * itemsize + xmsg_read_bytes
                           + n_pad * cout_pad * 4 + n_pad * 4 + e_pad * 4),
    )

    kernel = functools.partial(_unigat_attend_kernel,
                               tile_e=tile_e, xmsg_resident=xmsg_resident)

    out = pl.pallas_call(
        kernel,
        out_shape=jax.ShapeDtypeStruct((n_pad, cout_pad), jnp.float32),
        grid_spec=pltpu.PrefetchScalarGridSpec(
            num_scalar_prefetch=0,
            grid=grid,
            in_specs=[
                pl.BlockSpec((tile_n, tile_e), lambda i, k: (i, k)),  # B1 tile (dominant)
                pl.BlockSpec((tile_n, 1), lambda i, k: (i, 0)),       # e_tgt
                pl.BlockSpec((1, tile_e), lambda i, k: (0, k)),       # e_src
                xmsg_spec,                                            # x_msg
            ],
            out_specs=pl.BlockSpec((tile_n, cout_pad), lambda i, k: (i, 0)),
            scratch_shapes=[pltpu.VMEM((tile_n, cout_pad), jnp.float32)],
        ),
        compiler_params=pltpu.CompilerParams(
            dimension_semantics=("parallel", "arbitrary"),  # N across TCs, E = reduction
            vmem_limit_bytes=vmem_limit_bytes,
        ),
        cost_estimate=cost,
    )(b1_p, e_tgt_p, e_src_p, xmsg_p)

    return out[:n, :cout]


def unigat_ref(x_0, b1, weight, att_weight):
    """Pure-JAX f32 reference for verification."""
    cin = weight.shape[0]
    a_src = att_weight[:cin]
    a_tgt = att_weight[cin:]
    m01 = b1.T @ x_0
    logits = (x_0 @ a_tgt)[:, None] + (m01 @ a_src)[None, :]
    att = jax.nn.elu(logits)
    return (b1 * att) @ (m01 @ weight)


if __name__ == "__main__":
    key = jax.random.PRNGKey(0)
    N, E, Cin, Cout = 80, 200, 8, 32            # n_nodes, n_edges, in/out channels
    k1, k2, k3, k4 = jax.random.split(key, 4)

    x0 = jax.random.normal(k1, (N, Cin), jnp.float32)
    # dense 0/1 incidence matrix B_1 (n_nodes, n_edges)
    b1 = (jax.random.uniform(k2, (N, E)) < 0.3).astype(jnp.float32)

    # deterministic xavier_uniform-style init (gain 1.414 as in topomodelx Conv)
    limit_w = 1.414 * (6.0 / (Cin + Cout)) ** 0.5
    weight = jax.random.uniform(k3, (Cin, Cout), jnp.float32, -limit_w, limit_w)
    limit_a = 1.414 * (6.0 / (2 * Cin + 1)) ** 0.5
    att_weight = jax.random.uniform(k4, (2 * Cin,), jnp.float32, -limit_a, limit_a)

    ref = unigat_ref(x0, b1, weight, att_weight)
    tol = 5e-2 * max(1.0, float(jnp.max(jnp.abs(ref))))   # bf16 MXU operands vs f32 ref

    # (a) Small tiles so the test exercises a real (2,2) grid with E-axis accumulation
    #     and the VMEM-resident x_msg path.
    out = unigat_layer(x0, b1, weight, att_weight, tile_n=64, tile_e=128)
    out = jax.block_until_ready(out)
    assert out.shape == (N, Cout), out.shape
    err = float(jnp.max(jnp.abs(out - ref)))
    assert err <= tol, (err, tol)

    # (b) Force the streamed (per-k) x_msg path as well.
    out2 = unigat_layer(x0, b1, weight, att_weight, tile_n=64, tile_e=128,
                        xmsg_resident_bytes=0)
    out2 = jax.block_until_ready(out2)
    err2 = float(jnp.max(jnp.abs(out2 - ref)))
    assert err2 <= tol, (err2, tol)

    print("KERNEL_OK")
</pallas_src>

<mosaic_0001>
module attributes {stable_mosaic.version = 11 : i64} {
  func.func @_unigat_attend_kernel(%arg0: i32, %arg1: i32, %arg2: memref<64x128xbf16, #tpu.memory_space<vmem>>, %arg3: memref<64x1xf32, #tpu.memory_space<vmem>>, %arg4: memref<1x128xf32, #tpu.memory_space<vmem>>, %arg5: memref<256x128xbf16, #tpu.memory_space<vmem>>, %arg6: memref<64x128xf32, #tpu.memory_space<vmem>>, %arg7: memref<64x128xf32, #tpu.memory_space<vmem>>) attributes {dimension_semantics = [#tpu.dimension_semantics<parallel>, #tpu.dimension_semantics<arbitrary>], iteration_bounds = array<i64: 2, 2>, scalar_prefetch = 0 : i64, scratch_operands = 1 : i64, tpu.core_type = #tpu.core_type<tc>, window_params = [{transform_indices = @transform_0, window_bounds = array<i64: 64, 128>}, {transform_indices = @transform_1, window_bounds = array<i64: 64, 1>}, {transform_indices = @transform_2, window_bounds = array<i64: 1, 128>}, {pipeline_mode = #tpu.pipeline_mode<synchronous>, transform_indices = @transform_3, window_bounds = array<i64: 256, 128>}, {transform_indices = @transform_4, window_bounds = array<i64: 64, 128>}]} {
    %c0_i32 = arith.constant 0 : i32
    %0 = arith.cmpi eq, %arg1, %c0_i32 : i32
    %1 = arith.extui %0 : i1 to i32
    %c0_i32_0 = arith.constant 0 : i32
    %2 = arith.cmpi ne, %1, %c0_i32_0 : i32
    scf.if %2 {
      %cst_15 = arith.constant 0.000000e+00 : f32
      %30 = vector.broadcast %cst_15 : f32 to vector<64x128xf32>
      %c0_16 = arith.constant 0 : index
      %c0_17 = arith.constant 0 : index
      %31 = vector.load %arg7[%c0_16, %c0_17] : memref<64x128xf32, #tpu.memory_space<vmem>>, vector<64x128xf32>
      tpu.vector_store %arg7[%c0_16, %c0_17], %30 {strides = array<i32>} : memref<64x128xf32, #tpu.memory_space<vmem>>, vector<64x128xf32>,
    } else {
    }
    %c0 = arith.constant 0 : index
    %c0_1 = arith.constant 0 : index
    %3 = vector.load %arg3[%c0, %c0_1] : memref<64x1xf32, #tpu.memory_space<vmem>>, vector<64x1xf32>
    %c0_2 = arith.constant 0 : index
    %c0_3 = arith.constant 0 : index
    %4 = vector.load %arg4[%c0_2, %c0_3] : memref<1x128xf32, #tpu.memory_space<vmem>>, vector<1x128xf32>
    %5 = vector.broadcast %3 : vector<64x1xf32> to vector<64x128xf32>
    %6 = vector.broadcast %4 : vector<1x128xf32> to vector<64x128xf32>
    %7 = arith.addf %5, %6 : vector<64x128xf32>
    %cst = arith.constant 0.000000e+00 : f32
    %8 = vector.broadcast %cst : f32 to vector<64x128xf32>
    %9 = arith.maximumf %7, %8 : vector<64x128xf32>
    %cst_4 = arith.constant 0.000000e+00 : f32
    %10 = vector.broadcast %cst_4 : f32 to vector<64x128xf32>
    %11 = arith.minimumf %7, %10 : vector<64x128xf32>
    %12 = math.exp %11 : vector<64x128xf32>
    %13 = arith.addf %9, %12 : vector<64x128xf32>
    %cst_5 = arith.constant 1.000000e+00 : f32
    %14 = vector.broadcast %cst_5 : f32 to vector<64x128xf32>
    %15 = arith.subf %13, %14 : vector<64x128xf32>
    %c0_6 = arith.constant 0 : index
    %c0_7 = arith.constant 0 : index
    %16 = vector.load %arg2[%c0_6, %c0_7] : memref<64x128xbf16, #tpu.memory_space<vmem>>, vector<64x128xbf16>
    %17 = arith.truncf %15 : vector<64x128xf32> to vector<64x128xbf16>
    %18 = arith.mulf %16, %17 : vector<64x128xbf16>
    %c128_i32 = arith.constant 128 : i32
    %19 = arith.muli %arg1, %c128_i32 : i32
    %20 = tpu.assume_multiple %19, 128 : i32
    %21 = arith.index_cast %20 : i32 to index
    %c0_8 = arith.constant 0 : index
    %22 = vector.load %arg5[%21, %c0_8] : memref<256x128xbf16, #tpu.memory_space<vmem>>, vector<128x128xbf16>
    %c0_9 = arith.constant 0 : index
    %c0_10 = arith.constant 0 : index
    %23 = vector.load %arg7[%c0_9, %c0_10] : memref<64x128xf32, #tpu.memory_space<vmem>>, vector<64x128xf32>
    %cst_11 = arith.constant dense<0.000000e+00> : vector<64x128xf32>
    %24 = tpu.matmul %18, %22, %cst_11 {dimension_numbers = #tpu.dot_dimension_numbers<[1], [0], [0], [1], [0, 0, 1, 1], [], []>} : vector<64x128xbf16>, vector<128x128xbf16>, vector<64x128xf32> -> vector<64x128xf32>
    %25 = arith.addf %23, %24 : vector<64x128xf32>
    %c0_12 = arith.constant 0 : index
    %c0_13 = arith.constant 0 : index
    %26 = vector.load %arg7[%c0_12, %c0_13] : memref<64x128xf32, #tpu.memory_space<vmem>>, vector<64x128xf32>
    tpu.vector_store %arg7[%c0_12, %c0_13], %25 {strides = array<i32>} : memref<64x128xf32, #tpu.memory_space<vmem>>, vector<64x128xf32>,
    %c1_i32 = arith.constant 1 : i32
    %27 = arith.cmpi eq, %arg1, %c1_i32 : i32
    %28 = arith.extui %27 : i1 to i32
    %c0_i32_14 = arith.constant 0 : i32
    %29 = arith.cmpi ne, %28, %c0_i32_14 : i32
    scf.if %29 {
      %c0_15 = arith.constant 0 : index
      %c0_16 = arith.constant 0 : index
      %30 = vector.load %arg7[%c0_15, %c0_16] : memref<64x128xf32, #tpu.memory_space<vmem>>, vector<64x128xf32>
      %c0_17 = arith.constant 0 : index
      %c0_18 = arith.constant 0 : index
      %31 = vector.load %arg6[%c0_17, %c0_18] : memref<64x128xf32, #tpu.memory_space<vmem>>, vector<64x128xf32>
      tpu.vector_store %arg6[%c0_17, %c0_18], %30 {strides = array<i32>} : memref<64x128xf32, #tpu.memory_space<vmem>>, vector<64x128xf32>,
    } else {
    }
    return
  }
  func.func @transform_0(%arg0: i32, %arg1: i32) -> (i32, i32) {
    %c0_i32 = arith.constant 0 : i32
    return %arg0, %arg1 : i32, i32
  }
  func.func @transform_1(%arg0: i32, %arg1: i32) -> (i32, i32) {
    %c0_i32 = arith.constant 0 : i32
    %c0_i32_0 = arith.constant 0 : i32
    return %arg0, %c0_i32 : i32, i32
  }
  func.func @transform_2(%arg0: i32, %arg1: i32) -> (i32, i32) {
    %c0_i32 = arith.constant 0 : i32
    %c0_i32_0 = arith.constant 0 : i32
    return %c0_i32, %arg1 : i32, i32
  }
  func.func @transform_3(%arg0: i32, %arg1: i32) -> (i32, i32) {
    %c0_i32 = arith.constant 0 : i32
    %c0_i32_0 = arith.constant 0 : i32
    %c0_i32_1 = arith.constant 0 : i32
    return %c0_i32, %c0_i32_0 : i32, i32
  }
  func.func @transform_4(%arg0: i32, %arg1: i32) -> (i32, i32) {
    %c0_i32 = arith.constant 0 : i32
    %c0_i32_0 = arith.constant 0 : i32
    return %arg0, %c0_i32 : i32, i32
  }
}

</mosaic_0001>

<bundles_post_ra>
// kernel: tpu_custom_call.1
= control target key start
LH: loop header
LB: loop body
LE: loop exit
PB: predicated region body
PF: predicated region fallthrough
CT: control target
= control target key end

     0   :  { %9 = vsyncpa [#allocation5], 0  ;;  %s1513_s0 = inlined_call_operand.vmem [shape: bf16[128,256], index: 0, kind: input, shape index: {}]   ;;  %s1514_s1 = inlined_call_operand.vmem [shape: f32[128,1], index: 1, kind: input, shape index: {}]   ;;  %s1515_s2 = inlined_call_operand.vmem [shape: f32[1,256], index: 2, kind: input, shape index: {}]   ;;  %s1516_s3 = inlined_call_operand.hbm [shape: bf16[256,128], index: 3, kind: input, shape index: {}]   ;;  %s1517_s4 = inlined_call_operand.hbm [shape: f32[128,128], index: 4, kind: output, shape index: {}]  }
   0x1   :  { %10 = vsyncpa [#allocation6], 0 }
   0x2   :  { %12 = vsyncpa [#allocation6 + $0x1], 0  ;;  %s1259_s15 = smov 0   ;;  %s1261_s16 = smov 0  }
   0x3   :  { %s1263_s17 = smov 0   ;;  %s1265_s18 = smov 0  }
   0x4   :  { %s1267_s19 = smov 0   ;;  %s1269_s20 = smov 0  }
   0x5   :  { %s1271_s21 = smov 0   ;;  %s1273_s22 = smov 0  }
   0x6   :  { %s1275_s23 = smov 0   ;;  %s1277_s24 = smov 0  }
   0x7 LB: > { %1523 = sst [smem:[#allocation10_spill]] %s1196_s17  ;;  %s841_s25 = sadd.s32 4294967295, %s1224_s24   ;;  %s1224_s24 = sphi %s1277_s24, %s18_s24   ;;  %s1220_s23 = sphi %s1275_s23, %s1549_s23   ;;  %s1216_s22 = sphi %s1273_s22, %s1548_s22   ;;  %s1212_s21 = sphi %s1271_s21, %s1547_s21   ;;  %s1208_s20 = sphi %s1269_s20, %s1546_s20   ;;  %s1204_s19 = sphi %s1267_s19, %s1545_s19   ;;  %s1200_s18 = sphi %s1265_s18, %s1544_s18   ;;  %s1196_s17 = sphi %s1263_s17, %s1538_s17   ;;  %s1192_s16 = sphi %s1261_s16, %s1543_s16   ;;  %s1188_s15 = sphi %s1259_s15, %s1542_s15  }
   0x8   : > { %s842_s26 = sadd.s32 4294967294, %s1224_s24   ;;  %s27_s27 = sadd.s32 1, %s1216_s22 }
   0x9   : > { %s30_s28 = sadd.s32 1, %s1220_s23  ;;  %p28_p0 = scmp.ge.s32.totalorder %s27_s27, 2 }
   0xa   : > { %s39_s29 = sadd.s32 1, %s1204_s19  ;;  %p46_p1 = scmp.ne.s32.totalorder %s1204_s19, %s1200_s18 }
   0xb   : > { %p47_p2 = scmp.eq.s32.totalorder %s1224_s24, 0  ;;  %s1551_s27 = smov (%p28_p0, %s27_s27), 0 }
   0xc   : > { %1524 = sst [smem:[#allocation11_spill]] %s1551_s27  ;;  %s1553_s28 = smov (!%p28_p0, %s30_s28), %s1220_s23 }
   0xd   : > { %s35_s30 = ssub.s32 %s1216_s22, %s1551_s27  ;;  %p1322_p3 = por %p47_p2, %p46_p1 }
   0xe   : > { %p32_p4 = scmp.ge.s32.totalorder %s1553_s28, 2  ;;  %s138_s6 = sadd.s32 1, %s1196_s17 }
   0xf   : > { %p148_p5 = scmp.ne.s32.totalorder %s1196_s17, %s1192_s16  ;;  %p149_p6 = scmp.eq.s32.totalorder %s841_s25, 3 }
  0x10   : > { %s1555_s28 = smov (%p32_p4, %s1553_s28), 0  ;;  %p154_p8 = scmp.ne.s32.totalorder %s1192_s16, %s1188_s15 }
  0x11   : > { %1526 = sst [smem:[#allocation12_spill]] %s1555_s28  ;;  %p1331_p7 = por %p149_p6, %p148_p5 }
  0x12   : > { %s34_s8 = ssub.s32 %s1220_s23, %s1555_s28  ;;  %p155_p9 = scmp.eq.s32.totalorder %s842_s26, 3 }
  0x13   : > { %s1527_s7 = scalar_select %p1331_p7, 1, 0 }
  0x14   : > { %s36_s9 = sor.u32 %s35_s30, %s34_s8  ;;  %p136_p10 = scmp.eq.s32.totalorder %s34_s8, 0 }
  0x15   : > { %p37_p11 = scmp.eq.s32.totalorder %s36_s9, 0  ;;  %p1339_p12 = por %p155_p9, %p154_p8 }
  0x16   : > { %s1344_s11 = scalar_select %p136_p10, %s1196_s17, %s138_s6  }
  0x17   : > { %s1528_s10 = scalar_select %p1339_p12, 1, 0 }
  0x18   : > { %1530 = sst [smem:[#allocation14_spill]] %s1344_s11  ;;  %p843_p13 = scmp.ge.s32.totalorder %s1224_s24, 1 }
  0x19   : > { %1529 = sst [smem:[#allocation13_spill]] %s1528_s10  ;;  %p162_p0 = scmp.lt.s32.totalorder %s1224_s24, 5 }
  0x1a   : > { %s1347_s12 = scalar_select %p37_p11, %s1204_s19, %s39_s29  }
  0x1b   : > { %p1351_p1 = scmp.eq.s32.totalorder %s841_s25, 0  ;;  %p1355_p2 = pnand %p843_p13, %p162_p0 }
  0x1c   : > { %1531 = sst [smem:[#allocation15_spill]] %s1347_s12  ;;  %s1226_s26 = smov [#allocation4]  }
  0x1d   : > { %s174_s30 = sshll.u32 %s1226_s26, 4  ;;  %p962_p4 = pneg %p1355_p2  ;;  %s175_s30 = int_to_ptr.vmem [resolvable:$true] %s174_s30 }
  0x1e   : > { %s1097_s29 = scalar_lea.vmem %s175_s30, 2048  ;;  %p1105_p11 = scmp.lt.s32.totalorder %s175_s30, %s175_s30 }
  0x1f   : > { %p963_p5 = pnand %p1351_p1, %p962_p4  ;;  %p1098_p8 = scmp.ne.s32.totalorder %s175_s30, %s1097_s29 }
  0x20   : > { %p1106_p12 = scmp.lt.s32.totalorder %s1097_s29, %s1097_s29 }
  0x21   : > { %p1088_p6 = pneg %p963_p5 }
  0x22   : > { %p1107_p7 = por %p1106_p12, %p1105_p11 }
  0x23   : > { %p1100_p9 = pnand %p1098_p8, %p1088_p6 }
  0x25   : > { %p1101_p10 = pneg %p1100_p9 }
  0x27   : > { %p1108_p13 = pnand %p1107_p7, %p1101_p10 }
  0x29   : > { %1111 = shalt.err (!%p1108_p13)
}
  0x2a   : > { %s1227_s25 = smov 64   ;;  %s1228_s6 = smov 4  }
  0x2b   : > { %965 = dma.hbm_to_vmem [thread:$0]  (!%p963_p5), %s1516_s3, 2048, %s175_s30, [#allocation5], %s1227_s25, %s1227_s25, %s1228_s6  }
  0x2c   : > { %p845_p0 = scmp.ge.s32.totalorder %s1224_s24, 4 }
  0x2e   : > { %184 = sbr.rel (%p845_p0) target bundleno = 62 (0x3e), region = 20 }
  0x33   : > { %187 = sbr.rel (!%p1322_p3) target bundleno = 62 (0x3e), region = 24  ;;  %s189_s26 = sand.u32 (%p1322_p3), 1, %s1204_s19  }
  0x34   : > { %s894_s29 = sshll.u32 (%p1322_p3), %s1220_s23, 4  ;;  %s846_s28 = sshll.u32 (%p1322_p3), %s189_s26, 5 }
  0x35   : > { %s194_s27 = sadd.s32 (%p1322_p3), %s1216_s22, %s894_s29  ;;  %s191_s30 = scalar_lea.vmem (%p1322_p3), [#allocation3], %s846_s28 }
  0x36   : > { %s849_s12 = sshll.u32 (%p1322_p3), %s194_s27, 2 }
  0x37   : > { %s196_s10 = scalar_lea.vmem (%p1322_p3), %s1513_s0, %s849_s12 }
  0x38   : > { %v213_v0 = vld [vmem:[%s196_s10] sm:$0xf]  ;;  %v215_v1 = vld [vmem:[%s196_s10 + $0x8] sm:$0xf]  ;;  %v217_v2 = vld [vmem:[%s196_s10 + $0x10] sm:$0xf] }
  0x39   : > { %214 = vst [vmem:[%s191_s30] sm:$0xf] %v213_v0  ;;  %216 = vst [vmem:[%s191_s30 + $0x4] sm:$0xf] %v215_v1  ;;  %v219_v3 = vld [vmem:[%s196_s10 + $0x18] sm:$0xf] }
  0x3a   : > { %218 = vst [vmem:[%s191_s30 + $0x8] sm:$0xf] %v217_v2  ;;  %v221_v4 = vld [vmem:[%s196_s10 + $0x20] sm:$0xf]  ;;  %v223_v5 = vld [vmem:[%s196_s10 + $0x28] sm:$0xf] }
  0x3b   : > { %220 = vst [vmem:[%s191_s30 + $0xc] sm:$0xf] %v219_v3  ;;  %222 = vst [vmem:[%s191_s30 + $0x10] sm:$0xf] %v221_v4  ;;  %v225_v6 = vld [vmem:[%s196_s10 + $0x30] sm:$0xf] }
  0x3c   : > { %224 = vst [vmem:[%s191_s30 + $0x14] sm:$0xf] %v223_v5  ;;  %v227_v7 = vld [vmem:[%s196_s10 + $0x38] sm:$0xf]  ;;  %226 = vst [vmem:[%s191_s30 + $0x18] sm:$0xf] %v225_v6 }
  0x3d   : > { %228 = vst [vmem:[%s191_s30 + $0x1c] sm:$0xf] %v227_v7 }
  0x3e PF: > { %286 = sbr.rel (%p1355_p2) target bundleno = 487 (0x1e7), region = 73  ;;  %s289_s17 = sand.u32 (!%p1355_p2), 1, %s1200_s18  }
  0x3f   : > { %s851_s27 = sshll.u32 (!%p1355_p2), %s289_s17, 5 }
  0x40   : > { %s1378_s28 = scalar_lea.vmem (!%p1355_p2), [#allocation3], %s851_s27 }
  0x43   : > { %1179 = dma.done.wait (%p1351_p1), [#allocation5], 2048  }
  0x44   : > { %1181 = vsyncadd (%p1351_p1), [#allocation5], 4294965248  ;;  %s323_s5 = sand.u32 1, %s1192_s16   ;;  %s854_s10 = sshll.u32 %s1212_s21, 3 }
  0x45   : > { %s853_s11 = sshll.u32 %s323_s5, 6  ;;  %p328_p3 = scmp.lt.s32.totalorder %s854_s10, 15 }
  0x46   : > { %p333_p7 = scmp.lt.s32.totalorder %s1208_s20, 1  ;;  %s1401_s26 = scalar_lea.vmem [#allocation7], %s853_s11 }
  0x47   : > { %s1557_s10 = smov (!%p328_p3, %s854_s10), 15  ;;  %p856_p12 = scmp.ne.s32.totalorder %s1208_s20, 0 }
  0x48   : > { %s1390_s18 = scalar_select %p333_p7, %s1208_s20, 1 }
  0x49   : > { %s855_s12 = sshll.u32 %s1557_s10, 3  ;;  %341 = sbr.rel (%p856_p12) target bundleno = 83 (0x53), region = 85 }
  0x4a   : > { %s1395_s13 = scalar_lea.vmem %s1514_s1, %s855_s12  ;;  %s335_s9 = scalar_lea.vmem %s1515_s2, %s1390_s18 }
  0x4e   : > { %v1229_v8 = vmov 0.0  }
  0x4f   : > { %342 = vst [vmem:[#allocation2 + $0x30] sm:$0xff] %v1229_v8  ;;  %343 = vst [vmem:[#allocation2] sm:$0xff] %v1229_v8 }
  0x50   : > { %344 = vst [vmem:[#allocation2 + $0x18] sm:$0xff] %v1229_v8  ;;  %345 = vst [vmem:[#allocation2 + $0x10] sm:$0xff] %v1229_v8 }
  0x51   : > { %346 = vst [vmem:[#allocation2 + $0x8] sm:$0xff] %v1229_v8  ;;  %347 = vst [vmem:[#allocation2 + $0x20] sm:$0xff] %v1229_v8 }
  0x52   : > { %348 = vst [vmem:[#allocation2 + $0x28] sm:$0xff] %v1229_v8  ;;  %349 = vst [vmem:[#allocation2 + $0x38] sm:$0xff] %v1229_v8 }
  0x53 PF: > { %v354_v9 = vld [vmem:[%s1395_s13 + $0x20] sm:$0xff]  ;;  %s874_s29 = sshll.u32 %s1208_s20, 7  ;;  %v1230_v11 = vmov 0   ;;  %v355_v12 = vld [vmem:[%s1395_s13 + $0x28] sm:$0xff]  ;;  %v353_v15 = vld [vmem:[%s1395_s13 + $0x18] sm:$0xff]  ;;  %p888_p1 = scmp.ne.s32.totalorder %s1208_s20, 1 }
  0x54   : > { %v350_v10 = vld [vmem:[%s1395_s13] sm:$0xff]  ;;  %1061 = vset.pattern.permute.xlu1 %v1230_v11  ;;  %1060 = vset.pattern.permute.xlu0 %v1230_v11  ;;  %s510_s30 = sshra.s32 %s874_s29, 3  ;;  %v351_v13 = vld [vmem:[%s1395_s13 + $0x8] sm:$0xff]  ;;  %v352_v16 = vld [vmem:[%s1395_s13 + $0x10] sm:$0xff] }
  0x55   : > { %381 = vperm.xlu1 %1061, %v354_v9   ;;  %361 = vperm.xlu0 %1060, %v350_v10   ;;  %s875_s17 = sshll.u32 %s510_s30, 2  ;;  %v357_v18 = vld [vmem:[%s1395_s13 + $0x38] sm:$0xff]  ;;  %v356_v19 = vld [vmem:[%s1395_s13 + $0x30] sm:$0xff]  ;;  %v857_v26 = vld [vmem:[%s335_s9] ss:$0 sm:$0xff] }
  0x56   : > { %s1409_s27 = scalar_lea.vmem [#allocation4], %s875_s17 }
  0x57   : > { %v1062_v14 = vld [vmem:[%s1409_s27 + $0x38] sm:$0xff]   ;;  %v1063_v17 = vld [vmem:[%s1409_s27 + $0x30] sm:$0xff]   ;;  %v1064_v20 = vld [vmem:[%s1409_s27 + $0x28] sm:$0xff]  }
  0x58   : > { %916 = vmatprep.subr.bf16.mxu0 %v1062_v14  ;;  %940 = vmatprep.subr.bf16.mxu1 %v1062_v14  ;;  %v1065_v21 = vld [vmem:[%s1409_s27 + $0x20] sm:$0xff]   ;;  %v1066_v22 = vld [vmem:[%s1409_s27 + $0x18] sm:$0xff]   ;;  %v1067_v23 = vld [vmem:[%s1409_s27 + $0x10] sm:$0xff]  }
  0x59   : > { %386 = vperm.xlu1 %1061, %v355_v12   ;;  %366 = vperm.xlu0 %1060, %v351_v13   ;;  %v1068_v24 = vld [vmem:[%s1409_s27 + $0x8] sm:$0xff]   ;;  %v1069_v25 = vld [vmem:[%s1409_s27] sm:$0xff]  }
  0x5a   : > { %917 = vmatpush3.bf16.msra.mxu0 %v1062_v14  ;;  %948 = vmatpush3.bf16.msra.mxu1 %v1062_v14 }
  0x5b   : > { %918 = vmatprep.subr.bf16.mxu0 %v1063_v17  ;;  %941 = vmatprep.subr.bf16.mxu1 %v1063_v17 }
  0x5d   : > { %376 = vperm.xlu1 %1061, %v353_v15   ;;  %371 = vperm.xlu0 %1060, %v352_v16   ;;  %v465_v16 = vld [vmem:[%s1378_s28 + $0x10] sm:$0xf] }
  0x5e   : > { %919 = vmatpush3.bf16.msra.mxu0 %v1063_v17  ;;  %949 = vmatpush3.bf16.msra.mxu1 %v1063_v17  ;;  %v466_v17 = vld [vmem:[%s1378_s28 + $0x14] sm:$0xf] }
  0x5f   : > { %920 = vmatprep.subr.bf16.mxu0 %v1064_v20  ;;  %942 = vmatprep.subr.bf16.mxu1 %v1064_v20 }
  0x61   : > { %396 = vperm.xlu1 %1061, %v357_v18   ;;  %391 = vperm.xlu0 %1060, %v356_v19  }
  0x62   : > { %921 = vmatpush3.bf16.msra.mxu0 %v1064_v20  ;;  %950 = vmatpush3.bf16.msra.mxu1 %v1064_v20  ;;  %v461_v20 = vld [vmem:[%s1378_s28] sm:$0xf] }
  0x63   : > { %922 = vmatprep.subr.bf16.mxu0 %v1065_v21  ;;  %943 = vmatprep.subr.bf16.mxu1 %v1065_v21 }
  0x66   : > { %923 = vmatpush3.bf16.msra.mxu0 %v1065_v21  ;;  %951 = vmatpush3.bf16.msra.mxu1 %v1065_v21  ;;  %v462_v21 = vld [vmem:[%s1378_s28 + $0x4] sm:$0xf] }
  0x67   : > { %924 = vmatprep.subr.bf16.mxu0 %v1066_v22  ;;  %944 = vmatprep.subr.bf16.mxu1 %v1066_v22 }
  0x6a   : > { %925 = vmatpush3.bf16.msra.mxu0 %v1066_v22  ;;  %952 = vmatpush3.bf16.msra.mxu1 %v1066_v22 }
  0x6b   : > { %926 = vmatprep.subr.bf16.mxu0 %v1067_v23  ;;  %945 = vmatprep.subr.bf16.mxu1 %v1067_v23 }
  0x6e   : > { %927 = vmatpush3.bf16.msra.mxu0 %v1067_v23  ;;  %953 = vmatpush3.bf16.msra.mxu1 %v1067_v23 }
  0x6f   : > { %928 = vmatprep.subr.bf16.mxu0 %v1068_v24  ;;  %946 = vmatprep.subr.bf16.mxu1 %v1068_v24 }
  0x72   : > { %929 = vmatpush3.bf16.msra.mxu0 %v1068_v24  ;;  %954 = vmatpush3.bf16.msra.mxu1 %v1068_v24 }
  0x73   : > { %930 = vmatprep.subr.bf16.mxu0 %v1069_v25  ;;  %947 = vmatprep.subr.bf16.mxu1 %v1069_v25 }
  0x76   : > { %931 = vmatpush3.bf16.msra.mxu0 %v1069_v25  ;;  %955 = vmatpush3.bf16.msra.mxu1 %v1069_v25 }
  0xd0   : > { %v382_v27 = vpop.permute.xlu1 %381  ;;  %v362_v28 = vpop.permute.xlu0 %361 }
  0xd1   : > { %v409_v29 = vadd.f32 %v857_v26, %v382_v27  ;;  %v405_v30 = vadd.f32 %v857_v26, %v362_v28 }
  0xd3   : > { %v425_v31 = vmin.f32 %v409_v29, 0.0  ;;  %v421_v32 = vmin.f32 %v405_v30, 0.0  ;;  %v417_v59 = vmax.f32 %v409_v29, 0.0  ;;  %v413_v61 = vmax.f32 %v405_v30, 0.0 }
  0xd4   : > { %v387_v33 = vpop.permute.xlu1 %386  ;;  %v367_v34 = vpop.permute.xlu0 %366 }
  0xd5   : > { %v437_v35 = vmul.f32 1.442695, %v425_v31  ;;  %v429_v36 = vmul.f32 1.442695, %v421_v32  ;;  %v410_v37 = vadd.f32 %v857_v26, %v387_v33  ;;  %v406_v38 = vadd.f32 %v857_v26, %v367_v34  ;;  %v464_v34 = vld [vmem:[%s1378_s28 + $0xc] sm:$0xf] }
  0xd7   : > { %1070 = vpow2.f32 %v437_v35  ;;  %v426_v39 = vmin.f32 %v410_v37, 0.0  ;;  %v422_v40 = vmin.f32 %v406_v38, 0.0  ;;  %v418_v1 = vmax.f32 %v410_v37, 0.0 }
  0xd8   : > { %1072 = vpow2.f32 %v429_v36  ;;  %v377_v41 = vpop.permute.xlu1 %376  ;;  %v372_v42 = vpop.permute.xlu0 %371  ;;  %v414_v4 = vmax.f32 %v406_v38, 0.0 }
  0xd9   : > { %v439_v43 = vmul.f32 1.442695, %v426_v39  ;;  %v408_v44 = vadd.f32 %v857_v26, %v377_v41  ;;  %v407_v45 = vadd.f32 %v857_v26, %v372_v42  ;;  %v431_v46 = vmul.f32 1.442695, %v422_v40  ;;  %v463_v39 = vld [vmem:[%s1378_s28 + $0x8] sm:$0xf] }
  0xdb   : > { %1074 = vpow2.f32 %v439_v43  ;;  %v424_v47 = vmin.f32 %v408_v44, 0.0  ;;  %v423_v48 = vmin.f32 %v407_v45, 0.0  ;;  %v416_v9 = vmax.f32 %v408_v44, 0.0 }
  0xdc   : > { %1076 = vpow2.f32 %v431_v46  ;;  %v397_v49 = vpop.permute.xlu1 %396  ;;  %v392_v50 = vpop.permute.xlu0 %391  ;;  %v415_v13 = vmax.f32 %v407_v45, 0.0 }
  0xdd   : > { %v435_v51 = vmul.f32 1.442695, %v424_v47  ;;  %v412_v52 = vadd.f32 %v857_v26, %v397_v49  ;;  %v411_v53 = vadd.f32 %v857_v26, %v392_v50  ;;  %v433_v54 = vmul.f32 1.442695, %v423_v48  ;;  %v468_v47 = vld [vmem:[%s1378_s28 + $0x1c] sm:$0xf] }
  0xde   : > { %v467_v49 = vld [vmem:[%s1378_s28 + $0x18] sm:$0xf] }
  0xdf   : > { %1078 = vpow2.f32 %v435_v51  ;;  %v428_v55 = vmin.f32 %v412_v52, 0.0  ;;  %v427_v56 = vmin.f32 %v411_v53, 0.0  ;;  %v420_v26 = vmax.f32 %v412_v52, 0.0 }
  0xe0   : > { %1080 = vpow2.f32 %v433_v54  ;;  %v419_v31 = vmax.f32 %v411_v53, 0.0 }
  0xe1   : > { %v443_v57 = vmul.f32 1.442695, %v428_v55  ;;  %v441_v58 = vmul.f32 1.442695, %v427_v56  ;;  %v532_v55 = vld [vmem:[#allocation2 + $0x18] sm:$0xff] }
  0xe3   : > { %1082 = vpow2.f32 %v443_v57  ;;  %v530_v57 = vld [vmem:[#allocation2 + $0x30] sm:$0xff] }
  0xe4   : > { %v1071_v60 = vpop.eup %1070  ;;  %1084 = vpow2.f32 %v441_v58 }
  0xe5   : > { %v1073_v62 = vpop.eup %1072  ;;  %v449_v63 = vadd.f32 %v1071_v60, %v417_v59  ;;  %v533_v60 = vld [vmem:[#allocation2 + $0x10] sm:$0xff] }
  0xe6   : > { %v445_v0 = vadd.f32 %v1073_v62, %v413_v61  ;;  %v536_v61 = vld [vmem:[#allocation2 + $0x28] sm:$0xff] }
  0xe7   : > { %v862_v2 = vadd.f32 -1.0, %v449_v63 }
  0xe8   : > { %v1075_v3 = vpop.eup %1074  ;;  %v858_v5 = vadd.f32 -1.0, %v445_v0 }
  0xe9   : > { %v1077_v6 = vpop.eup %1076  ;;  %v450_v7 = vadd.f32 %v1075_v3, %v418_v1  ;;  %v899_v11 = vpack.c.bf16 %v862_v2, %v862_v2  ;;  %v531_v1 = vld [vmem:[#allocation2] sm:$0xff]  ;;  %v534_v2 = vld [vmem:[#allocation2 + $0x8] sm:$0xff] }
  0xea   : > { %v446_v8 = vadd.f32 %v1077_v6, %v414_v4  ;;  %v895_v15 = vpack.c.bf16 %v858_v5, %v858_v5 }
  0xeb   : > { %v863_v10 = vadd.f32 -1.0, %v450_v7  ;;  %v505_v27 = vmul.bf16 %v899_v11, %v465_v16  ;;  %v537_v7 = vld [vmem:[#allocation2 + $0x38] sm:$0xff]  ;;  %v535_v11 = vld [vmem:[#allocation2 + $0x20] sm:$0xff] }
  0xec   : > { %v1079_v12 = vpop.eup %1078  ;;  %v859_v14 = vadd.f32 -1.0, %v446_v8  ;;  %v501_v32 = vmul.bf16 %v895_v15, %v461_v20 }
  0xed   : > { %v1081_v18 = vpop.eup %1080  ;;  %v448_v19 = vadd.f32 %v1079_v12, %v416_v9  ;;  %v900_v22 = vpack.c.bf16 %v863_v10, %v863_v10 }
  0xee   : > { %v447_v23 = vadd.f32 %v1081_v18, %v415_v13  ;;  %v896_v24 = vpack.c.bf16 %v859_v14, %v859_v14 }
  0xef   : > { %v861_v25 = vadd.f32 -1.0, %v448_v19  ;;  %v506_v28 = vmul.bf16 %v900_v22, %v466_v17 }
  0xf0   : > { %v1083_v29 = vpop.eup %1082  ;;  %v860_v30 = vadd.f32 -1.0, %v447_v23  ;;  %v502_v33 = vmul.bf16 %v896_v24, %v462_v21 }
  0xf1   : > { %v1085_v35 = vpop.eup %1084  ;;  %v898_v36 = vpack.c.bf16 %v861_v25, %v861_v25  ;;  %v452_v37 = vadd.f32 %v1083_v29, %v420_v26  ;;  %v878_v38 = vcombine.low %v505_v27, %v506_v28 }
  0xf2   : > { %v897_v40 = vpack.c.bf16 %v860_v30, %v860_v30  ;;  %v451_v41 = vadd.f32 %v1085_v35, %v419_v31  ;;  %v876_v42 = vcombine.low %v501_v32, %v502_v33 }
  0xf3   : > { %v865_v43 = vadd.f32 -1.0, %v452_v37  ;;  %936 = vmatprep.mubr.bf16.mxu1 %v878_v38  ;;  %v504_v44 = vmul.bf16 %v898_v36, %v464_v34 }
  0xf4   : > { %v864_v45 = vadd.f32 -1.0, %v451_v41  ;;  %932 = vmatprep.mubr.bf16.mxu0 %v876_v42  ;;  %v503_v46 = vmul.bf16 %v897_v40, %v463_v39 }
  0xf5   : > { %v902_v48 = vpack.c.bf16 %v865_v43, %v865_v43 }
  0xf6   : > { %v901_v50 = vpack.c.bf16 %v864_v45, %v864_v45  ;;  %v877_v51 = vcombine.low %v503_v46, %v504_v44 }
  0xf7   : > { %v508_v52 = vmul.bf16 %v902_v48, %v468_v47 }
  0xf8   : > { %933 = vmatmul.mubr.bf16.vlgmr.msra.gmra.mxu0 %v877_v51  ;;  %v507_v53 = vmul.bf16 %v901_v50, %v467_v49 }
  0xfa   : > { %v879_v54 = vcombine.low %v507_v53, %v508_v52 }
  0xfc   : > { %937 = vmatmul.mubr.bf16.vlgmr.msra.gmra.mxu1 %v879_v54 }
 0x1b8   : > { %v934_v56 = vpop.f32.mrf.mxu0 }
 0x1b9   : > { %v677_v58 = vadd.f32 %v934_v56, %v532_v55 }
 0x1ba   : > { %v644_v59 = vpop.f32.mrf.mxu0 }
 0x1bb   : > { %685 = vst [vmem:[#allocation2 + $0x18] sm:$0xff] %v677_v58  ;;  %v675_v62 = vadd.f32 %v644_v59, %v530_v57 }
 0x1bc   : > { %v935_v63 = vpop.f32.mrf.mxu0  ;;  %v938_v0 = vpop.f32.mrf.mxu1 }
 0x1bd   : > { %683 = vst [vmem:[#allocation2 + $0x30] sm:$0xff] %v675_v62  ;;  %v678_v3 = vadd.f32 %v935_v63, %v533_v60  ;;  %v681_v4 = vadd.f32 %v938_v0, %v536_v61 }
 0x1be   : > { %v647_v5 = vpop.f32.mrf.mxu0  ;;  %v660_v6 = vpop.f32.mrf.mxu1 }
 0x1bf   : > { %686 = vst [vmem:[#allocation2 + $0x10] sm:$0xff] %v678_v3  ;;  %689 = vst [vmem:[#allocation2 + $0x28] sm:$0xff] %v681_v4  ;;  %v676_v8 = vadd.f32 %v647_v5, %v531_v1  ;;  %v679_v9 = vadd.f32 %v660_v6, %v534_v2 }
 0x1c0   : > { %v939_v10 = vpop.f32.mrf.mxu1 }
 0x1c1   : > { %684 = vst [vmem:[#allocation2] sm:$0xff] %v676_v8  ;;  %687 = vst [vmem:[#allocation2 + $0x8] sm:$0xff] %v679_v9  ;;  %v682_v12 = vadd.f32 %v939_v10, %v537_v7  ;;  %694 = sbr.rel (%p888_p1) target bundleno = 462 (0x1ce), region = 89 }
 0x1c2   : > { %v663_v13 = vpop.f32.mrf.mxu1 }
 0x1c3   : > { %690 = vst [vmem:[#allocation2 + $0x38] sm:$0xff] %v682_v12  ;;  %v680_v14 = vadd.f32 %v663_v13, %v535_v11 }
 0x1c5   : > { %688 = vst [vmem:[#allocation2 + $0x20] sm:$0xff] %v680_v14 }
 0x1c6   : > { %v695_v15 = vld [vmem:[#allocation2 + $0x30] sm:$0xff]  ;;  %v697_v17 = vld [vmem:[#allocation2 + $0x18] sm:$0xff]  ;;  %v701_v21 = vld [vmem:[#allocation2 + $0x28] sm:$0xff] }
 0x1c7   : > { %703 = vst [vmem:[%s1401_s26] sm:$0xff] %v695_v15  ;;  %705 = vst [vmem:[%s1401_s26 + $0x10] sm:$0xff] %v697_v17  ;;  %v698_v18 = vld [vmem:[#allocation2 + $0x10] sm:$0xff] }
 0x1c8   : > { %v696_v16 = vld [vmem:[#allocation2] sm:$0xff]  ;;  %v699_v19 = vld [vmem:[#allocation2 + $0x8] sm:$0xff]  ;;  %706 = vst [vmem:[%s1401_s26 + $0x18] sm:$0xff] %v698_v18  ;;  %709 = vst [vmem:[%s1401_s26 + $0x30] sm:$0xff] %v701_v21 }
 0x1c9   : > { %704 = vst [vmem:[%s1401_s26 + $0x8] sm:$0xff] %v696_v16  ;;  %707 = vst [vmem:[%s1401_s26 + $0x20] sm:$0xff] %v699_v19 }
 0x1ca   : > { %v702_v22 = vld [vmem:[#allocation2 + $0x38] sm:$0xff] }
 0x1cb   : > { %710 = vst [vmem:[%s1401_s26 + $0x38] sm:$0xff] %v702_v22 }
 0x1cc   : > { %v700_v20 = vld [vmem:[#allocation2 + $0x20] sm:$0xff] }
 0x1cd   : > { %708 = vst [vmem:[%s1401_s26 + $0x28] sm:$0xff] %v700_v20 }
 0x1ce PF: > { %s903_s20 = sshll.u32 %s1212_s21, 10  ;;  %s725_s14 = sshll.u32 %s1401_s26, 4  ;;  %s1452_s14 = int_to_ptr.vmem [resolvable:$true] %s725_s14 }
 0x1cf   : > { %s1449_s12 = scalar_lea.hbm %s1517_s4, %s903_s20  ;;  %s1456_s25 = scalar_lea.sflag [#allocation6], %s323_s5 }
 0x1d0   : > { %s1112_s13 = scalar_lea.vmem %s1452_s14, 1024  ;;  %p1534_p4 = scmp.ne.s32.totalorder %s1527_s7, 0 }
 0x1d1   : > { %p1113_p2 = scmp.ne.s32.totalorder %s1452_s14, %s1112_s13  ;;  %s1231_s21 = smov [#allocation7]  }
 0x1d2   : > { %s1116_s6 = sshll.u32 %s1231_s21, 4  ;;  %s1117_s6 = int_to_ptr.vmem [resolvable:$false] %s1116_s6 }
 0x1d3   : > { %p1114_p5 = pnand %p1113_p2, %p1534_p4  ;;  %s1118_s8 = scalar_lea.vmem %s1117_s6, 2048 }
 0x1d4   : > { %p1119_p8 = scmp.lt.s32.totalorder %s1452_s14, %s1117_s6  ;;  %p1120_p9 = scmp.lt.s32.totalorder %s1118_s8, %s1112_s13 }
 0x1d5   : > { %p1115_p6 = pneg %p1114_p5 }
 0x1d6   : > { %p1121_p10 = por %p1120_p9, %p1119_p8 }
 0x1d8   : > { %p1122_p11 = pnand %p1121_p10, %p1115_p6 }
 0x1da   : > { %1125 = shalt.err (!%p1122_p11)
}
 0x1db   : > { %s1126_s5 = scalar_lea.hbm %s1449_s12, 1024  ;;  %s1130_s29 = scalar_lea.hbm %s1517_s4, 2048 }
 0x1dc   : > { %p1127_p13 = scmp.ne.s32.totalorder %s1449_s12, %s1126_s5  ;;  %p1131_p7 = scmp.lt.s32.totalorder %s1449_s12, %s1517_s4 }
 0x1dd   : > { %p1132_p12 = scmp.lt.s32.totalorder %s1130_s29, %s1126_s5 }
 0x1de   : > { %p1128_p0 = pnand %p1127_p13, %p1534_p4 }
 0x1df   : > { %p1133_p1 = por %p1132_p12, %p1131_p7 }
 0x1e0   : > { %p1129_p3 = pneg %p1128_p0 }
 0x1e2   : > { %p1134_p2 = pnand %p1133_p1, %p1129_p3 }
 0x1e4   : > { %1137 = shalt.err (!%p1134_p2)
}
 0x1e5   : > { %s1232_s27 = smov 128   ;;  %s1233_s10 = smov 8  }
 0x1e6   : > { %960 = dma.vmem_to_hbm [thread:$0]  (%p1534_p4), %s1452_s14, 1024, %s1449_s12, %s1456_s25, %s1232_s27, %s1232_s27, %s1233_s10  }
 0x1e7 PF: > { %s1535_s11 = sld [smem:[#allocation13_spill]]  ;;  %p972_p5 = scmp.ge.s32.totalorder %s1224_s24, 2 }
 0x1e8   : > { %s740_s20 = sand.u32 1, %s1188_s15  }
 0x1e9   : > { %s741_s28 = scalar_lea.sflag [#allocation6], %s740_s20 }
 0x1ed   : > { %p1536_p6 = scmp.ne.s32.totalorder %s1535_s11, 0 }
 0x1ef   : > { %p967_p8 = pnand %p972_p5, %p1536_p6 }
 0x1f1   : > { %p968_p9 = pneg %p967_p8 }
 0x1f3   : > { %1183 = dma.done.wait (%p968_p9), %s741_s28, 1024  }
 0x1f4   : > { %1185 = vsyncadd (%p968_p9), %s741_s28, 4294966272  ;;  %s18_s24 = sadd.s32 1, %s1224_s24   ;;  %s1537_s18 = sld [smem:[#allocation10_spill]] }
 0x1f5   : > { %p15_p10 = scmp.ge.s32.totalorder %s18_s24, 6   ;;  %s1538_s17 = sld [smem:[#allocation14_spill]] }
 0x1f6   : > { %s1539_s7 = sld [smem:[#allocation15_spill]]  ;;  %s1542_s15 = smov %s1192_s16 }
 0x1f7   : > { %s1540_s12 = sld [smem:[#allocation11_spill]]  ;;  %s1546_s20 = smov %s1216_s22 }
 0x1f8   : > { %s1541_s14 = sld [smem:[#allocation12_spill]]  ;;  %s1547_s21 = smov %s1220_s23 }
 0x1fa   : > { %s1543_s16 = smov %s1537_s18  ;;  %s1544_s18 = smov %s1204_s19 }
 0x1fb   :  { %17 = sbr.rel (!%p15_p10) target bundleno = 7 (0x7), region = 137 }
 0x1fc   : > { %s1545_s19 = smov %s1539_s7 }
 0x1fd   : > { %s1548_s22 = smov %s1540_s12 }
 0x1fe   : > { %s1549_s23 = smov %s1541_s14 }
 0x200   :  { %746 = vsyncpa [#allocation5], 1 }
 0x201   :  { %748 = vsyncpa [#allocation5 + $0x1], 1 }
 0x202   :  { %749 = vsyncpa [#allocation6], 1 }
 0x203   :  { %751 = vsyncpa [#allocation6 + $0x1], 1 }

</bundles_post_ra>
